<compile_context>
chip_gen: v7x
topology: tpu7x:2x2x1
jax: 0.10.0
libtpu: 0.0.40
codegen_flags: <defaults>
</compile_context>

<pallas_src>
import functools

import jax
import jax.numpy as jnp
from jax.experimental import pallas as pl
from jax.experimental.pallas import tpu as pltpu


# ----------------------------------------------------------------------------
# Pallas kernel: 3 row-shifted matmuls -> ReLU -> folded-BN scale/shift
# ----------------------------------------------------------------------------
def _unet_block_kernel(tile_h, x_ref, w_ref, scale_ref, shift_ref, o_ref):
    # x_ref:     (tile_h + 2, Wp*C_in)        bf16   (row tile + 2-row halo)
    # w_ref:     (3, Wp*C_in, W_out*C_out)    bf16   (per-kh folded conv taps)
    # scale_ref: (1, W_out*C_out)             f32
    # shift_ref: (1, W_out*C_out)             f32
    # o_ref:     (tile_h, W_out*C_out)        f32    (lane-dense output block)
    acc = jnp.dot(x_ref[0:tile_h, :], w_ref[0],
                  preferred_element_type=jnp.float32)
    acc = acc + jnp.dot(x_ref[1:tile_h + 1, :], w_ref[1],
                        preferred_element_type=jnp.float32)
    acc = acc + jnp.dot(x_ref[2:tile_h + 2, :], w_ref[2],
                        preferred_element_type=jnp.float32)
    act = jnp.maximum(acc, 0.0)                       # ReLU
    o_ref[...] = act * scale_ref[...] + shift_ref[...]  # eval-mode BatchNorm


# ----------------------------------------------------------------------------
# Wrapper: layout prep (NHWC rows), folded weights, pallas_call
# ----------------------------------------------------------------------------
def unet_conv_block_forward(x, conv_w, bn_gamma, bn_beta, bn_mean, bn_var,
                            *, padding=True, eps=1e-5, tile_h=8):
    """x: (N, C_in, H, W) f32; conv_w: (C_out, C_in, 3, 3) f32. Returns NCHW."""
    N, C_in, H, W = x.shape
    C_out = conv_w.shape[0]
    pad = int(padding)
    H_out = H + 2 * pad - 2
    W_out = W + 2 * pad - 2
    Hp, Wp = H + 2 * pad, W + 2 * pad
    WpC = Wp * C_in
    WoCo = W_out * C_out

    # Row tile must be sublane-aligned (multiple of 8).
    tile_h = max(8, (tile_h // 8) * 8)
    T = -(-H_out // tile_h)                       # cdiv
    rows_needed = T * tile_h + 2

    # --- input: NCHW -> padded NHWC rows (N, Hp, Wp*C_in), bf16 ---------------
    x_nhwc = jnp.transpose(x, (0, 2, 3, 1))
    xp = jnp.pad(x_nhwc, ((0, 0), (pad, pad), (pad, pad), (0, 0)))
    xp = xp.reshape(N, Hp, WpC)
    if rows_needed > Hp:                          # pad rows so every tile has a halo
        xp = jnp.pad(xp, ((0, 0), (0, rows_needed - Hp), (0, 0)))
    xp = xp.astype(jnp.bfloat16)

    # Overlapping row windows (cheap ~1.25x duplication, replaces 9x im2col).
    row_idx = jnp.arange(T)[:, None] * tile_h + jnp.arange(tile_h + 2)[None, :]
    xw = xp[:, row_idx, :]                        # (N, T, tile_h+2, Wp*C_in)

    # --- fold the 3x3 conv taps into 3 wide matrices (one per kh) -------------
    # B[kh, (w+kw)*C_in + ci, w*C_out + co] = conv_w[co, ci, kh, kw]
    taps = jnp.transpose(conv_w, (2, 3, 1, 0)).astype(jnp.float32)   # (kh,kw,Ci,Co)
    shifts = jnp.stack([jnp.eye(Wp, W_out, k=-kw, dtype=jnp.float32)
                        for kw in range(3)])                          # (kw,Wp,Wo)
    B = jnp.einsum('kpw,hkio->hpiwo', shifts, taps)
    B = B.reshape(3, WpC, WoCo).astype(jnp.bfloat16)

    # --- fold eval-mode BatchNorm into per-channel scale / shift --------------
    inv_std = 1.0 / jnp.sqrt(bn_var.astype(jnp.float32) + eps)
    scale_c = bn_gamma.astype(jnp.float32) * inv_std
    shift_c = bn_beta.astype(jnp.float32) - bn_mean.astype(jnp.float32) * scale_c
    scale = jnp.tile(scale_c, (W_out,)).reshape(1, WoCo)   # layout: w*C_out + co
    shift = jnp.tile(shift_c, (W_out,)).reshape(1, WoCo)

    kernel = functools.partial(_unet_block_kernel, tile_h)
    cost = pl.CostEstimate(
        flops=2 * N * T * 3 * tile_h * WpC * WoCo,
        transcendentals=0,
        bytes_accessed=(xw.size * 2 + B.size * 2
                        + (scale.size + shift.size) * 4
                        + N * T * tile_h * WoCo * 4),
    )

    out_rows = pl.pallas_call(
        kernel,
        out_shape=jax.ShapeDtypeStruct((N, T * tile_h, WoCo), jnp.float32),
        grid=(N, T),
        in_specs=[
            # per-(batch, row-tile) input window with halo
            pl.BlockSpec((None, None, tile_h + 2, WpC), lambda n, t: (n, t, 0, 0)),
            # folded weights / BN affine stay resident across the grid
            pl.BlockSpec((3, WpC, WoCo), lambda n, t: (0, 0, 0)),
            pl.BlockSpec((1, WoCo), lambda n, t: (0, 0)),
            pl.BlockSpec((1, WoCo), lambda n, t: (0, 0)),
        ],
        out_specs=pl.BlockSpec((None, tile_h, WoCo), lambda n, t: (n, t, 0)),
        compiler_params=pltpu.CompilerParams(
            dimension_semantics=("parallel", "parallel"),
            vmem_limit_bytes=32 * 1024 * 1024),
        cost_estimate=cost,
    )(xw, B, scale, shift)

    # (N, H_out, W_out*C_out) -> NCHW
    out = out_rows[:, :H_out, :].reshape(N, H_out, W_out, C_out)
    return jnp.transpose(out, (0, 3, 1, 2))


# ----------------------------------------------------------------------------
# Pure-JAX reference (for correctness check)
# ----------------------------------------------------------------------------
def _reference(x, conv_w, bn_gamma, bn_beta, bn_mean, bn_var,
               *, padding=True, eps=1e-5):
    pad = int(padding)
    y = jax.lax.conv_general_dilated(
        x, conv_w, window_strides=(1, 1),
        padding=[(pad, pad), (pad, pad)],
        dimension_numbers=("NCHW", "OIHW", "NCHW"))
    y = jnp.maximum(y, 0.0)
    inv_std = 1.0 / jnp.sqrt(bn_var + eps)
    scale = (bn_gamma * inv_std)[None, :, None, None]
    shift = (bn_beta - bn_mean * bn_gamma * inv_std)[None, :, None, None]
    return y * scale + shift


if __name__ == "__main__":
    # Module config: input_channels=4, output_channels=8, activation=ReLU,
    # padding=True, dropout=0.0, batch_normalization=True.
    N, C_in, H, W = 2, 4, 16, 16
    C_out = 8

    key = jax.random.PRNGKey(0)
    k_x, k_w, k_g, k_b, k_m, k_v = jax.random.split(key, 6)

    x = jax.random.normal(k_x, (N, C_in, H, W), dtype=jnp.float32)
    conv_w = jax.random.normal(k_w, (C_out, C_in, 3, 3), dtype=jnp.float32) * 0.1
    bn_gamma = jax.random.uniform(k_g, (C_out,), minval=0.5, maxval=1.5)
    bn_beta = jax.random.normal(k_b, (C_out,)) * 0.1
    bn_mean = jax.random.normal(k_m, (C_out,)) * 0.1
    bn_var = jax.random.uniform(k_v, (C_out,), minval=0.5, maxval=1.5)

    fwd = jax.jit(functools.partial(unet_conv_block_forward, padding=True))
    out = fwd(x, conv_w, bn_gamma, bn_beta, bn_mean, bn_var)
    out = jax.block_until_ready(out)

    # Reference with the same bf16 rounding of the matmul operands (the kernel
    # accumulates the bf16 products in f32), so only accumulation-order noise
    # remains.
    x_r = x.astype(jnp.bfloat16).astype(jnp.float32)
    w_r = conv_w.astype(jnp.bfloat16).astype(jnp.float32)
    ref = _reference(x_r, w_r, bn_gamma, bn_beta, bn_mean, bn_var, padding=True)

    assert out.shape == (N, C_out, H, W), out.shape
    assert jnp.allclose(out, ref, atol=2e-3, rtol=2e-3), \
        float(jnp.max(jnp.abs(out - ref)))

    print("KERNEL_OK")
</pallas_src>

<mosaic_0001>
module attributes {stable_mosaic.version = 11 : i64} {
  func.func @_unet_block_kernel(%arg0: i32, %arg1: i32, %arg2: memref<1x1x10x72xbf16, #tpu.memory_space<vmem>>, %arg3: memref<3x72x128xbf16, #tpu.memory_space<vmem>>, %arg4: memref<1x128xf32, #tpu.memory_space<vmem>>, %arg5: memref<1x128xf32, #tpu.memory_space<vmem>>, %arg6: memref<1x8x128xf32, #tpu.memory_space<vmem>>) attributes {dimension_semantics = [#tpu.dimension_semantics<parallel>, #tpu.dimension_semantics<parallel>], iteration_bounds = array<i64: 2, 2>, scalar_prefetch = 0 : i64, scratch_operands = 0 : i64, tpu.core_type = #tpu.core_type<tc>, window_params = [{transform_indices = @transform_0, window_bounds = array<i64: 1, 1, 10, 72>}, {pipeline_mode = #tpu.pipeline_mode<synchronous>, transform_indices = @transform_1, window_bounds = array<i64: 3, 72, 128>}, {pipeline_mode = #tpu.pipeline_mode<synchronous>, transform_indices = @transform_2, window_bounds = array<i64: 1, 128>}, {pipeline_mode = #tpu.pipeline_mode<synchronous>, transform_indices = @transform_3, window_bounds = array<i64: 1, 128>}, {transform_indices = @transform_4, window_bounds = array<i64: 1, 8, 128>}]} {
    %c0 = arith.constant 0 : index
    %c0_0 = arith.constant 0 : index
    %c0_1 = arith.constant 0 : index
    %c0_2 = arith.constant 0 : index
    %0 = vector.load %arg2[%c0, %c0_0, %c0_1, %c0_2] : memref<1x1x10x72xbf16, #tpu.memory_space<vmem>>, vector<1x1x8x72xbf16>
    %1 = vector.shape_cast %0 : vector<1x1x8x72xbf16> to vector<8x72xbf16>
    %c0_3 = arith.constant 0 : index
    %c0_4 = arith.constant 0 : index
    %c0_5 = arith.constant 0 : index
    %2 = vector.load %arg3[%c0_3, %c0_4, %c0_5] : memref<3x72x128xbf16, #tpu.memory_space<vmem>>, vector<1x72x128xbf16>
    %3 = vector.shape_cast %2 : vector<1x72x128xbf16> to vector<72x128xbf16>
    %cst = arith.constant dense<0.000000e+00> : vector<8x128xf32>
    %4 = tpu.matmul %1, %3, %cst {dimension_numbers = #tpu.dot_dimension_numbers<[1], [0], [0], [1], [0, 0, 1, 1], [], []>} : vector<8x72xbf16>, vector<72x128xbf16>, vector<8x128xf32> -> vector<8x128xf32>
    %c0_6 = arith.constant 0 : index
    %c0_7 = arith.constant 0 : index
    %c1 = arith.constant 1 : index
    %c0_8 = arith.constant 0 : index
    %5 = vector.load %arg2[%c0_6, %c0_7, %c1, %c0_8] : memref<1x1x10x72xbf16, #tpu.memory_space<vmem>>, vector<1x1x8x72xbf16>
    %6 = vector.shape_cast %5 : vector<1x1x8x72xbf16> to vector<8x72xbf16>
    %c1_9 = arith.constant 1 : index
    %c0_10 = arith.constant 0 : index
    %c0_11 = arith.constant 0 : index
    %7 = vector.load %arg3[%c1_9, %c0_10, %c0_11] : memref<3x72x128xbf16, #tpu.memory_space<vmem>>, vector<1x72x128xbf16>
    %8 = vector.shape_cast %7 : vector<1x72x128xbf16> to vector<72x128xbf16>
    %cst_12 = arith.constant dense<0.000000e+00> : vector<8x128xf32>
    %9 = tpu.matmul %6, %8, %cst_12 {dimension_numbers = #tpu.dot_dimension_numbers<[1], [0], [0], [1], [0, 0, 1, 1], [], []>} : vector<8x72xbf16>, vector<72x128xbf16>, vector<8x128xf32> -> vector<8x128xf32>
    %10 = arith.addf %4, %9 : vector<8x128xf32>
    %c0_13 = arith.constant 0 : index
    %c0_14 = arith.constant 0 : index
    %c2 = arith.constant 2 : index
    %c0_15 = arith.constant 0 : index
    %11 = vector.load %arg2[%c0_13, %c0_14, %c2, %c0_15] : memref<1x1x10x72xbf16, #tpu.memory_space<vmem>>, vector<1x1x8x72xbf16>
    %12 = vector.shape_cast %11 : vector<1x1x8x72xbf16> to vector<8x72xbf16>
    %c2_16 = arith.constant 2 : index
    %c0_17 = arith.constant 0 : index
    %c0_18 = arith.constant 0 : index
    %13 = vector.load %arg3[%c2_16, %c0_17, %c0_18] : memref<3x72x128xbf16, #tpu.memory_space<vmem>>, vector<1x72x128xbf16>
    %14 = vector.shape_cast %13 : vector<1x72x128xbf16> to vector<72x128xbf16>
    %cst_19 = arith.constant dense<0.000000e+00> : vector<8x128xf32>
    %15 = tpu.matmul %12, %14, %cst_19 {dimension_numbers = #tpu.dot_dimension_numbers<[1], [0], [0], [1], [0, 0, 1, 1], [], []>} : vector<8x72xbf16>, vector<72x128xbf16>, vector<8x128xf32> -> vector<8x128xf32>
    %16 = arith.addf %10, %15 : vector<8x128xf32>
    %cst_20 = arith.constant 0.000000e+00 : f32
    %17 = vector.broadcast %cst_20 : f32 to vector<8x128xf32>
    %18 = arith.maximumf %16, %17 : vector<8x128xf32>
    %c0_21 = arith.constant 0 : index
    %c0_22 = arith.constant 0 : index
    %19 = vector.load %arg4[%c0_21, %c0_22] : memref<1x128xf32, #tpu.memory_space<vmem>>, vector<1x128xf32>
    %20 = vector.broadcast %19 : vector<1x128xf32> to vector<8x128xf32>
    %21 = arith.mulf %18, %20 : vector<8x128xf32>
    %c0_23 = arith.constant 0 : index
    %c0_24 = arith.constant 0 : index
    %22 = vector.load %arg5[%c0_23, %c0_24] : memref<1x128xf32, #tpu.memory_space<vmem>>, vector<1x128xf32>
    %23 = vector.broadcast %22 : vector<1x128xf32> to vector<8x128xf32>
    %24 = arith.addf %21, %23 : vector<8x128xf32>
    %c0_25 = arith.constant 0 : index
    %c0_26 = arith.constant 0 : index
    %c0_27 = arith.constant 0 : index
    %25 = vector.load %arg6[%c0_25, %c0_26, %c0_27] : memref<1x8x128xf32, #tpu.memory_space<vmem>>, vector<1x8x128xf32>
    %26 = vector.shape_cast %25 : vector<1x8x128xf32> to vector<8x128xf32>
    %27 = vector.shape_cast %24 : vector<8x128xf32> to vector<1x8x128xf32>
    tpu.vector_store %arg6[%c0_25, %c0_26, %c0_27], %27 {strides = array<i32>} : memref<1x8x128xf32, #tpu.memory_space<vmem>>, vector<1x8x128xf32>,
    return
  }
  func.func @transform_0(%arg0: i32, %arg1: i32) -> (i32, i32, i32, i32) {
    %c0_i32 = arith.constant 0 : i32
    %c0_i32_0 = arith.constant 0 : i32
    %c0_i32_1 = arith.constant 0 : i32
    return %arg0, %arg1, %c0_i32, %c0_i32_0 : i32, i32, i32, i32
  }
  func.func @transform_1(%arg0: i32, %arg1: i32) -> (i32, i32, i32) {
    %c0_i32 = arith.constant 0 : i32
    %c0_i32_0 = arith.constant 0 : i32
    %c0_i32_1 = arith.constant 0 : i32
    %c0_i32_2 = arith.constant 0 : i32
    return %c0_i32, %c0_i32_0, %c0_i32_1 : i32, i32, i32
  }
  func.func @transform_2(%arg0: i32, %arg1: i32) -> (i32, i32) {
    %c0_i32 = arith.constant 0 : i32
    %c0_i32_0 = arith.constant 0 : i32
    %c0_i32_1 = arith.constant 0 : i32
    return %c0_i32, %c0_i32_0 : i32, i32
  }
  func.func @transform_3(%arg0: i32, %arg1: i32) -> (i32, i32) {
    %c0_i32 = arith.constant 0 : i32
    %c0_i32_0 = arith.constant 0 : i32
    %c0_i32_1 = arith.constant 0 : i32
    return %c0_i32, %c0_i32_0 : i32, i32
  }
  func.func @transform_4(%arg0: i32, %arg1: i32) -> (i32, i32, i32) {
    %c0_i32 = arith.constant 0 : i32
    %c0_i32_0 = arith.constant 0 : i32
    return %arg0, %arg1, %c0_i32 : i32, i32, i32
  }
}

</mosaic_0001>

<bundles_post_ra>
// kernel: tile.13
= control target key start
LH: loop header
LB: loop body
LE: loop exit
PB: predicated region body
PF: predicated region fallthrough
CT: control target
= control target key end

     0   :  { %s28_s0 = inlined_call_operand.vmem [shape: f32[8], index: 0, kind: input, shape index: {}]   ;;  %s29_s1 = inlined_call_operand.vmem [shape: f32[16,8], index: 1, kind: output, shape index: {}]  }
   0x1   :  { %v4_v0 = vld [vmem:[%s28_s0] ss:$0 sm:$0xff] }
   0x2   :  { %5 = vst [vmem:[%s29_s1] sm:$0xff] %v4_v0  ;;  %8 = vst [vmem:[%s29_s1 + $0x8] sm:$0xff] %v4_v0 }

// kernel: tile.14
= control target key start
LH: loop header
LB: loop body
LE: loop exit
PB: predicated region body
PF: predicated region fallthrough
CT: control target
= control target key end

     0   :  { %s131_s10 = smov 120   ;;  %s132_s11 = smov 104   ;;  %vm3_vm0 = vcmask 64512   ;;  %vm9_vm1 = vcmask 1048512   ;;  %vm15_vm2 = vcmask 982912   ;;  %vm21_vm3 = vcmask 917312   ;;  %s207_s0 = inlined_call_operand.vmem [shape: f32[16,8], index: 0, kind: input, shape index: {}]   ;;  %s208_s1 = inlined_call_operand.vmem [shape: f32[1,128], index: 1, kind: output, shape index: {}]  }
   0x1   :  { %v101_v0 = vld [vmem:[%s207_s0 + $0xf] sm:$0x1]   ;;  %v103_v1 = vld [vmem:[%s207_s0 + $0xd] sm:$0x1]   ;;  %v102_v2 = vld [vmem:[%s207_s0 + $0xe] sm:$0x1]  }
   0x2   :  { %7 = vrot.lane.b32.xlu0 %v101_v0, %s131_s10  ;;  %19 = vrot.lane.b32.xlu1 %v103_v1, %s132_s11  ;;  %v104_v3 = vld [vmem:[%s207_s0 + $0xc] sm:$0x1]   ;;  %s133_s16 = smov 112   ;;  %s134_s17 = smov 96   ;;  %v105_v4 = vld [vmem:[%s207_s0 + $0xb] sm:$0x1]  }
   0x3   :  { %v106_v5 = vld [vmem:[%s207_s0 + $0xa] sm:$0x1]   ;;  %v2_v6 = vld [vmem:[%s207_s0] sm:$0x1]   ;;  %s135_s24 = smov 88   ;;  %s136_s25 = smov 80  }
   0x4   :  { %4 = vst.msk [vmem:[#allocation0] sm:$0x1] %vm3_vm0, %v2_v6   ;;  %v107_v7 = vld [vmem:[%s207_s0 + $0x9] sm:$0x1]   ;;  %v108_v8 = vld [vmem:[%s207_s0 + $0x8] sm:$0x1]  }
   0x5   :  { %s137_s30 = smov 72   ;;  %s138_s2 = smov 64   ;;  %v109_v9 = vld [vmem:[%s207_s0 + $0x7] sm:$0x1]   ;;  %v110_v10 = vld [vmem:[%s207_s0 + $0x6] sm:$0x1]  }
   0x6   :  { %13 = vrot.lane.b32.xlu0 %v102_v2, %s133_s16  ;;  %25 = vrot.lane.b32.xlu1 %v104_v3, %s134_s17  ;;  %s139_s7 = smov 56   ;;  %s140_s8 = smov 48   ;;  %v111_v11 = vld [vmem:[%s207_s0 + $0x5] sm:$0x1]   ;;  %v112_v12 = vld [vmem:[%s207_s0 + $0x4] sm:$0x1]  }
   0x7   :  { %s141_s13 = smov 40   ;;  %s142_s14 = smov 32   ;;  %v113_v13 = vld [vmem:[%s207_s0 + $0x3] sm:$0x1]   ;;  %v114_v14 = vld [vmem:[%s207_s0 + $0x2] sm:$0x1]  }
   0x8   :  { %s143_s19 = smov 24   ;;  %s144_s20 = smov 16   ;;  %v115_v15 = vld [vmem:[%s207_s0 + $0x1] sm:$0x1]   ;;  %vm27_vm4 = vcmask 851712   ;;  %vm33_vm5 = vcmask 786112  }
   0x9   :  { %s145_s0 = smov 8   ;;  %vm39_vm6 = vcmask 720512   ;;  %vm45_vm7 = vcmask 654912   ;;  %vm51_vm8 = vcmask 589312   ;;  %vm57_vm9 = vcmask 523712  }
   0xa   :  { %31 = vrot.lane.b32.xlu0 %v105_v4, %s135_s24  ;;  %37 = vrot.lane.b32.xlu1 %v106_v5, %s136_s25  ;;  %vm63_vm10 = vcmask 458112   ;;  %vm69_vm11 = vcmask 392512   ;;  %vm75_vm12 = vcmask 326912   ;;  %vm81_vm13 = vcmask 261312  }
   0xb   :  { %vm87_vm14 = vcmask 195712   ;;  %vm93_vm15 = vcmask 130112  }
   0xe   :  { %43 = vrot.lane.b32.xlu0 %v107_v7, %s137_s30  ;;  %49 = vrot.lane.b32.xlu1 %v108_v8, %s138_s2 }
  0x12   :  { %55 = vrot.lane.b32.xlu0 %v109_v9, %s139_s7  ;;  %61 = vrot.lane.b32.xlu1 %v110_v10, %s140_s8 }
  0x16   :  { %67 = vrot.lane.b32.xlu0 %v111_v11, %s141_s13  ;;  %73 = vrot.lane.b32.xlu1 %v112_v12, %s142_s14 }
  0x1a   :  { %79 = vrot.lane.b32.xlu0 %v113_v13, %s143_s19  ;;  %85 = vrot.lane.b32.xlu1 %v114_v14, %s144_s20 }
  0x1e   :  { %91 = vrot.lane.b32.xlu0 %v115_v15, %s145_s0 }
  0x74   :  { %v8_v16 = vpop.permute.xlu0 %7   ;;  %v20_v17 = vpop.permute.xlu1 %19  }
  0x75   :  { %10 = vst.msk [vmem:[#allocation0] sm:$0x1] %vm9_vm1, %v8_v16  }
  0x78   :  { %v14_v18 = vpop.permute.xlu0 %13   ;;  %v26_v19 = vpop.permute.xlu1 %25  }
  0x79   :  { %16 = vst.msk [vmem:[#allocation0] sm:$0x1] %vm15_vm2, %v14_v18  }
  0x7a   :  { %22 = vst.msk [vmem:[#allocation0] sm:$0x1] %vm21_vm3, %v20_v17  }
  0x7b   :  { %28 = vst.msk [vmem:[#allocation0] sm:$0x1] %vm27_vm4, %v26_v19  }
  0x7c   :  { %v32_v20 = vpop.permute.xlu0 %31   ;;  %v38_v21 = vpop.permute.xlu1 %37  }
  0x7d   :  { %34 = vst.msk [vmem:[#allocation0] sm:$0x1] %vm33_vm5, %v32_v20  }
  0x7e   :  { %40 = vst.msk [vmem:[#allocation0] sm:$0x1] %vm39_vm6, %v38_v21  }
  0x80   :  { %v44_v22 = vpop.permute.xlu0 %43   ;;  %v50_v23 = vpop.permute.xlu1 %49  }
  0x81   :  { %46 = vst.msk [vmem:[#allocation0] sm:$0x1] %vm45_vm7, %v44_v22  }
  0x82   :  { %52 = vst.msk [vmem:[#allocation0] sm:$0x1] %vm51_vm8, %v50_v23  }
  0x84   :  { %v56_v24 = vpop.permute.xlu0 %55   ;;  %v62_v25 = vpop.permute.xlu1 %61  }
  0x85   :  { %58 = vst.msk [vmem:[#allocation0] sm:$0x1] %vm57_vm9, %v56_v24  }
  0x86   :  { %64 = vst.msk [vmem:[#allocation0] sm:$0x1] %vm63_vm10, %v62_v25  }
  0x88   :  { %v68_v26 = vpop.permute.xlu0 %67   ;;  %v74_v27 = vpop.permute.xlu1 %73  }
  0x89   :  { %70 = vst.msk [vmem:[#allocation0] sm:$0x1] %vm69_vm11, %v68_v26  }
  0x8a   :  { %76 = vst.msk [vmem:[#allocation0] sm:$0x1] %vm75_vm12, %v74_v27  }
  0x8c   :  { %v80_v28 = vpop.permute.xlu0 %79   ;;  %v86_v29 = vpop.permute.xlu1 %85  }
  0x8d   :  { %82 = vst.msk [vmem:[#allocation0] sm:$0x1] %vm81_vm13, %v80_v28  }
  0x8e   :  { %88 = vst.msk [vmem:[#allocation0] sm:$0x1] %vm87_vm14, %v86_v29  }
  0x90   :  { %v92_v30 = vpop.permute.xlu0 %91  }
  0x91   :  { %94 = vst.msk [vmem:[#allocation0] sm:$0x1] %vm93_vm15, %v92_v30  }
  0x98   :  { %v98_v31 = vld [vmem:[#allocation0] sm:$0x1] }
  0x99   :  { %100 = vst [vmem:[%s208_s1] sm:$0x1] %v98_v31 }

// kernel: unet_conv_block_forward.1
= control target key start
LH: loop header
LB: loop body
LE: loop exit
PB: predicated region body
PF: predicated region fallthrough
CT: control target
= control target key end

     0   :  { %s853_s15 = smov 0   ;;  %s855_s16 = smov 0   ;;  %s999_s0 = inlined_call_operand.vmem [shape: bf16[2,2,10,72], index: 0, kind: input, shape index: {}]   ;;  %s1000_s1 = inlined_call_operand.vmem [shape: bf16[3,72,128], index: 1, kind: input, shape index: {}]   ;;  %s1001_s2 = inlined_call_operand.vmem [shape: f32[1,128], index: 2, kind: input, shape index: {}]   ;;  %s1002_s3 = inlined_call_operand.vmem [shape: f32[1,128], index: 3, kind: input, shape index: {}]   ;;  %s1003_s4 = inlined_call_operand.vmem [shape: f32[2,16,128], index: 4, kind: output, shape index: {}]  }
   0x1   :  { %s857_s17 = smov 0   ;;  %s859_s18 = smov 0  }
   0x2   :  { %s861_s19 = smov 0  }
   0x3 LB: > { %s23_s20 = sadd.s32 1, %s816_s17  ;;  %s26_s21 = sadd.s32 1, %s820_s18  ;;  %s824_s19 = sphi %s861_s19, %s14_s19   ;;  %s820_s18 = sphi %s859_s18, %s1007_s18   ;;  %s816_s17 = sphi %s857_s17, %s1006_s17   ;;  %s812_s16 = sphi %s855_s16, %s1005_s16   ;;  %s808_s15 = sphi %s853_s15, %s1004_s15  }
   0x4   : > { %p24_p0 = scmp.ge.s32.totalorder %s23_s20, 2  ;;  %p614_p1 = scmp.ge.s32.totalorder %s824_s19, 1 }
   0x5   : > { %p182_p2 = scmp.lt.s32.totalorder %s824_s19, 5 }
   0x6   : > { %s1009_s20 = smov (%p24_p0, %s23_s20), 0  ;;  %s1011_s21 = smov (!%p24_p0, %s26_s21), %s820_s18 }
   0x7   : > { %p183_p3 = pnand %p614_p1, %p182_p2  ;;  %p28_p4 = scmp.ge.s32.totalorder %s1011_s21, 2 }
   0x8   : > { %v769_v0 = vld [vmem:[%s1000_s1] sm:$0xff] (!%p183_p3)   ;;  %v826_v1 = vmov (!%p183_p3), 0.0   ;;  %v770_v2 = vld [vmem:[%s1000_s1 + $0x8] sm:$0xff] (!%p183_p3)   ;;  %vm827_vm0 = vmmov (!%p183_p3), 0   ;;  %p215_p5 = scmp.lt.s32.totalorder (!%p183_p3), %s812_s16, 1  ;;  %v771_v4 = vld [vmem:[%s1000_s1 + $0x10] sm:$0xff] (!%p183_p3)  }
   0x9   : > { %s1013_s21 = smov (%p28_p4, %s1011_s21), 0  ;;  %186 = sbr.rel (%p183_p3) target bundleno = 271 (0x10f), region = 36 }
   0xa   : > { %694 = vmatprep.subr.bf16.mxu0 (!%p183_p3), %v826_v1  ;;  %680 = vmatprep.subr.bf16.mxu1 (!%p183_p3), %v826_v1  ;;  %v774_v3 = vld [vmem:[%s1000_s1 + $0x24] sm:$0xff] (!%p183_p3)   ;;  %p217_p6 = scmp.lt.s32.totalorder (!%p183_p3), %s808_s15, 1  ;;  %v778_v5 = vld [vmem:[%s1000_s1 + $0x2c] sm:$0xff] (!%p183_p3)   ;;  %v773_v6 = vld [vmem:[%s1000_s1 + $0x20] ss:$0 sps:$4 sm:$0xff] (!%p183_p3)   ;;  %vm297_vm1 = vcmask (!%p183_p3), 1043456  }
   0xb   : > { %695 = vmatpush3.bf16.msra.mxu0 (!%p183_p3), %v769_v0  ;;  %704 = vmatprep.mubr.msk.bf16.mxu0 (!%p183_p3), %vm827_vm0, %v826_v1  ;;  %v772_v7 = vld [vmem:[%s1000_s1 + $0x18] sm:$0xff] (!%p183_p3)   ;;  %v372_v11 = vsel (!%p183_p3), %vm297_vm1, %v773_v6, 0  ;;  %v784_v14 = vld [vmem:[%s1000_s1 + $0x44] ss:$0 sps:$4 sm:$0xff] (!%p183_p3)   ;;  %vm293_vm2 = vcmask (!%p183_p3), 588800   ;;  %v777_v17 = vld [vmem:[%s1000_s1 + $0x48] sm:$0xff] (!%p183_p3)  }
   0xc   : > { %696 = vmatprep.subr.bf16.mxu0 (!%p183_p3), %v826_v1  ;;  %690 = vmatprep.mubr.msk.bf16.mxu1 (!%p183_p3), %vm827_vm0, %v826_v1  ;;  %v780_v8 = vld [vmem:[%s1000_s1 + $0x34] sm:$0xff] (!%p183_p3)   ;;  %v782_v13 = vld [vmem:[%s1000_s1 + $0x3c] sm:$0xff] (!%p183_p3)   ;;  %v299_v19 = vsel (!%p183_p3), %vm297_vm1, %v784_v14, 0  ;;  %v785_v25 = vld [vmem:[%s1000_s1 + $0x68] ss:$0 sps:$4 sm:$0xff] (!%p183_p3)  }
   0xd   : > { %681 = vmatpush3.bf16.msra.mxu1 (!%p183_p3), %v774_v3  ;;  %v779_v20 = vld [vmem:[%s1000_s1 + $0x50] sm:$0xff] (!%p183_p3)   ;;  %v781_v22 = vld [vmem:[%s1000_s1 + $0x58] sm:$0xff] (!%p183_p3)   ;;  %v783_v24 = vld [vmem:[%s1000_s1 + $0x60] sm:$0xff] (!%p183_p3)   ;;  %v460_v27 = vsel (!%p183_p3), %vm297_vm1, %v785_v25, 0 }
   0xe   : > { %682 = vmatprep.subr.bf16.mxu1 (!%p183_p3), %v826_v1  ;;  %v658_v36 = vld [vmem:[%s1001_s2] ss:$0 sm:$0xff] (!%p183_p3) }
   0xf   : > { %697 = vmatpush3.bf16.msra.mxu0 (!%p183_p3), %v770_v2  ;;  %v659_v40 = vld [vmem:[%s1002_s3] ss:$0 sm:$0xff] (!%p183_p3) }
  0x10   : > { %s1015_s16 = smov (!%p215_p5, %s812_s16), 1  ;;  %698 = vmatprep.subr.bf16.mxu0 %v826_v1  ;;  %s1017_s15 = smov (!%p217_p6, %s808_s15), 1 }
  0x11   : > { %s616_s30 = sshll.u32 %s1015_s16, 2  ;;  %s615_s11 = sshll.u32 %s1017_s15, 1  ;;  %683 = vmatpush3.bf16.msra.mxu1 %v778_v5 }
  0x12   : > { %s221_s12 = sadd.s32 %s616_s30, %s615_s11  ;;  %684 = vmatprep.subr.bf16.mxu1 %v826_v1  ;;  %s618_s14 = sshll.u32 %s1015_s16, 1 }
  0x13   : > { %699 = vmatpush3.bf16.msra.mxu0 %v771_v4  ;;  %s617_s22 = sshll.u32 %s221_s12, 2 }
  0x14   : > { %700 = vmatprep.subr.bf16.mxu0 %v826_v1  ;;  %s931_s25 = scalar_lea.vmem %s999_s0, %s617_s22  ;;  %s229_s22 = sadd.s32 %s618_s14, %s1017_s15 }
  0x15   : > { %v233_v9 = vld [vmem:[%s931_s25] sm:$0xf]  ;;  %v243_v10 = vld [vmem:[%s931_s25 + $0x4] sm:$0x1]  ;;  %685 = vmatpush3.bf16.msra.mxu1 %v780_v8 }
  0x16   : > { %v629_v12 = vcombine.low %v233_v9, %v243_v10  ;;  %686 = vmatprep.subr.bf16.mxu1 %v826_v1  ;;  %v414_v23 = vld [vmem:[%s931_s25] sm:$0xe]  ;;  %s619_s25 = sshll.u32 %s229_s22, 3 }
  0x17   : > { %701 = vmatpush3.bf16.msra.mxu0 %v772_v7  ;;  %v651_v26 = vcombine.low %v414_v23, %v243_v10  ;;  %s231_s15 = scalar_lea.vmem %s1003_s4, %s619_s25 }
  0x18   : > { %702 = vmatprep.subr.bf16.mxu0 %v826_v1  ;;  %v262_v15 = vshll.u32 %v629_v12, 16  ;;  %v260_v16 = vshrl.u32 %v629_v12, 16 }
  0x19   : > { %687 = vmatpush3.bf16.msra.mxu1 %v782_v13  ;;  %v428_v28 = vrot.slane %v651_v26, 1 }
  0x1a   : > { %v264_v18 = vrot.slane %v262_v15, 1  ;;  %688 = vmatprep.subr.bf16.mxu1 %v826_v1 }
  0x1b   : > { %703 = vmatpush3.bf16.msra.mxu0 %v372_v11 }
  0x1c   : > { %708 = vmatprep.subr.bf16.mxu0 %v826_v1  ;;  %v265_v21 = vor.u32 %v264_v18, %v260_v16 }
  0x1d   : > { %689 = vmatpush3.bf16.msra.mxu1 %v299_v19 }
  0x1e   : > { %705 = vmatmul.mubr.msk.bf16.vlgmr.msra.gmra.mrb[0].mxu0 %vm293_vm2, %v233_v9 }
  0x1f   : > { %709 = vmatpush3.bf16.msra.mxu0 %v777_v17  ;;  %718 = vmatprep.mubr.msk.bf16.mxu0 %vm827_vm0, %v826_v1 }
  0x20   : > { %710 = vmatprep.subr.bf16.mxu0 %v826_v1  ;;  %691 = vmatmul.mubr.msk.bf16.vlgmr.msra.gmra.mrb[0].mxu1 %vm293_vm2, %v265_v21 }
  0x23   : > { %711 = vmatpush3.bf16.msra.mxu0 %v779_v20 }
  0x24   : > { %712 = vmatprep.subr.bf16.mxu0 %v826_v1 }
  0x27   : > { %713 = vmatpush3.bf16.msra.mxu0 %v781_v22 }
  0x28   : > { %714 = vmatprep.subr.bf16.mxu0 %v826_v1 }
  0x2b   : > { %715 = vmatpush3.bf16.msra.mxu0 %v783_v24 }
  0x2c   : > { %716 = vmatprep.subr.bf16.mxu0 %v826_v1 }
  0x2f   : > { %717 = vmatpush3.bf16.msra.mxu0 %v460_v27 }
  0x32   : > { %719 = vmatmul.mubr.msk.bf16.vlgmr.msra.gmra.mrb[0].mxu0 %vm293_vm2, %v428_v28 }
  0xf3   : > { %v335_v29 = vpop.f32.mrb[0].mxu1 }
  0xf4   : > { %v692_v30 = vpop.f32.mrb[1].mxu1 }
  0xf5   : > { %v338_v31 = vpop.f32.mrb[2].mxu1 }
  0xf6   : > { %v693_v32 = vpop.f32.mrb[3].mxu1 }
 0x105   : > { %v496_v33 = vpop.f32.mrb[0].mxu0 }
 0x106   : > { %v722_v34 = vadd.f32 %v496_v33, %v335_v29  ;;  %v720_v35 = vpop.f32.mrb[1].mxu0 }
 0x107   : > { %v499_v37 = vpop.f32.mrb[2].mxu0 }
 0x108   : > { %v503_v38 = vmax.f32 %v722_v34, 0.0  ;;  %v721_v39 = vpop.f32.mrb[3].mxu0 }
 0x10a   : > { %v511_v41 = vmul.f32 %v658_v36, %v503_v38 }
 0x10c   : > { %v519_v42 = vadd.f32 %v659_v40, %v511_v41 }
 0x10e   : > { %520 = vst [vmem:[%s231_s15] sm:$0xff] %v519_v42 }
 0x10f PF: > { %s14_s19 = sadd.s32 1, %s824_s19   ;;  %s1004_s15 = smov %s816_s17 }
 0x110   : > { %p11_p7 = scmp.ge.s32.totalorder %s14_s19, 6   ;;  %s1005_s16 = smov %s820_s18 }
 0x111   : > { %s1006_s17 = smov %s1009_s20  ;;  %s1007_s18 = smov %s1013_s21 }
 0x112   :  { %13 = sbr.rel (!%p11_p7) target bundleno = 3 (0x3), region = 68 }

</bundles_post_ra>
